<compile_context>
chip_gen: v7x
topology: tpu7x:2x2x1
jax: 0.10.0
libtpu: 0.0.40
codegen_flags: <defaults>
</compile_context>

<pallas_src>
import functools

import numpy as np
import jax
import jax.numpy as jnp
from jax.experimental import pallas as pl
from jax.experimental.pallas import tpu as pltpu


def _nearest_src_indices(in_size: int, out_size: int) -> np.ndarray:
    # PyTorch 'nearest' source index: floor(dst * in / out), exact integer form.
    return (np.arange(out_size, dtype=np.int64) * in_size) // out_size


def _round_up(x: int, m: int) -> int:
    return ((x + m - 1) // m) * m


def _choose_tb(planes, h_in, w_in, h_out, w_out, itemsize) -> int:
    """Planes per grid step, from an explicit (lane/sublane-padded) VMEM estimate."""
    lane, sub = 128, 8
    wp_i, wp_o = _round_up(w_in, lane), _round_up(w_out, lane)
    hp_i = _round_up(h_in, lane)                 # S_h broadcast puts H_in on lanes
    h_i_s, h_o_s = _round_up(h_in, sub), _round_up(h_out, sub)
    w_i_s = _round_up(w_in, sub)
    per_plane = (
        2 * h_i_s * wp_i * itemsize              # input block (double-buffered)
        + 2 * h_o_s * wp_o * itemsize            # output block (double-buffered)
        + h_o_s * hp_i * itemsize                # broadcast S_h operand
        + w_i_s * wp_o * itemsize                # broadcast S_w operand
        + h_o_s * wp_i * itemsize                # intermediate t
        + h_o_s * wp_o * itemsize                # y before the store
    )
    budget = 8 * 1024 * 1024                     # keeps totals well under the 32 MiB limit
    tb = max(1, budget // per_plane)
    tb = min(tb, 256)                            # keep the batched-matmul unroll modest
    if planes >= 16:
        tb = min(tb, pl.cdiv(planes, 4))         # >=4 grid steps for DMA/compute overlap
    return int(min(tb, planes))


def _interp_kernel(x_ref, sh_ref, sw_ref, o_ref):
    # x_ref : (TB, H_in,  W_in )  input plane block (compute dtype)
    # sh_ref: (H_out, H_in)       one-hot row selection: S_h[ho,hi]=1 iff hi==h_idx[ho]
    # sw_ref: (W_in,  W_out)      one-hot col selection: S_w[wi,wo]=1 iff wi==w_idx[wo]
    # o_ref : (TB, H_out, W_out)
    tb = x_ref.shape[0]
    h_out, h_in = sh_ref.shape
    w_in, w_out = sw_ref.shape
    cdtype = sh_ref.dtype

    x = x_ref[...]                                                   # (TB, H_in, W_in)
    # Broadcast the tiny constant one-hots across the plane batch (hoisted once
    # per grid step; cost is budgeted in _choose_tb).
    sh = jnp.broadcast_to(sh_ref[...][None, :, :], (tb, h_out, h_in))
    sw = jnp.broadcast_to(sw_ref[...][None, :, :], (tb, w_in, w_out))

    # Batched 'bqk,bkd->bqd' contractions: contract lhs dim 2 with rhs dim 1,
    # batch over dim 0.  Accumulate in the compute dtype — exact, since every
    # output element is a copy (one-hot row), not a sum.
    dn = (((2,), (1,)), ((0,), (0,)))
    t = jax.lax.dot_general(sh, x, dn, preferred_element_type=cdtype)   # (TB, H_out, W_in)
    y = jax.lax.dot_general(t, sw, dn, preferred_element_type=cdtype)   # (TB, H_out, W_out)
    o_ref[...] = y.astype(o_ref.dtype)


@functools.partial(jax.jit, static_argnames=("size",))
def interpolate_nearest(x: jnp.ndarray, size) -> jnp.ndarray:
    """x: (N, C, H_in, W_in) -> (N, C, H_out, W_out), PyTorch 'nearest' rule."""
    n, c, h_in, w_in = x.shape
    h_out, w_out = size
    planes = n * c

    orig_dtype = x.dtype
    # bf16 stays bf16 on the MXU (full rate, exact copies); everything else
    # computes in f32 and is cast back at the end.
    cdtype = jnp.bfloat16 if orig_dtype == jnp.bfloat16 else jnp.float32

    # Trace-time (numpy) selection matrices -> compile-time constants.
    h_idx = _nearest_src_indices(h_in, h_out)                              # (H_out,)
    w_idx = _nearest_src_indices(w_in, w_out)                              # (W_out,)
    s_h = jnp.asarray(h_idx[:, None] == np.arange(h_in)[None, :], dtype=cdtype)   # (H_out, H_in)
    s_w = jnp.asarray(np.arange(w_in)[:, None] == w_idx[None, :], dtype=cdtype)   # (W_in, W_out)

    x3 = x.reshape(planes, h_in, w_in).astype(cdtype)

    tb = _choose_tb(planes, h_in, w_in, h_out, w_out, jnp.dtype(cdtype).itemsize)
    grid = (pl.cdiv(planes, tb),)

    # TODO(synk): for very large H_out*W_out per plane (TB forced to 1 and the
    # per-plane estimate above the budget), additionally tile H_out across a
    # second grid axis; not needed for typical interpolation sizes.
    out = pl.pallas_call(
        _interp_kernel,
        out_shape=jax.ShapeDtypeStruct((planes, h_out, w_out), cdtype),
        grid_spec=pltpu.PrefetchScalarGridSpec(
            num_scalar_prefetch=0,
            grid=grid,
            in_specs=[
                pl.BlockSpec((tb, h_in, w_in), lambda i: (i, 0, 0)),
                # Selection operands are a few KiB; default double-buffering of
                # them is negligible, so no pl.Buffered(1) needed anymore.
                pl.BlockSpec((h_out, h_in), lambda i: (0, 0)),
                pl.BlockSpec((w_in, w_out), lambda i: (0, 0)),
            ],
            out_specs=pl.BlockSpec((tb, h_out, w_out), lambda i: (i, 0, 0)),
        ),
        compiler_params=pltpu.CompilerParams(
            dimension_semantics=("parallel",),
            # Above v5e's 16 MiB scoped default, comfortably under v7x's
            # 64 MiB physical VMEM.
            vmem_limit_bytes=32 * 1024 * 1024,
        ),
    )(x3, s_h, s_w)

    return out.reshape(n, c, h_out, w_out).astype(orig_dtype)


def _reference_nearest(x, size):
    h_in, w_in = x.shape[-2:]
    h_out, w_out = size
    h_idx = jnp.asarray(_nearest_src_indices(h_in, h_out))
    w_idx = jnp.asarray(_nearest_src_indices(w_in, w_out))
    return x[:, :, h_idx, :][:, :, :, w_idx]


if __name__ == "__main__":
    key = jax.random.PRNGKey(0)
    x = jax.random.normal(key, (2, 4, 16, 16), dtype=jnp.float32)
    size = (32, 32)  # InterpolateLayer(size=(32, 32), mode='nearest')

    y = jax.block_until_ready(interpolate_nearest(x, size))
    y_ref = _reference_nearest(x, size)
    assert y.shape == (2, 4, 32, 32)
    # f32 path: tolerant check (robust to multi-pass f32 MXU rounding across
    # generations); an indexing bug would show up as O(1) errors, not 1e-3.
    assert jnp.allclose(y, y_ref, atol=1e-3, rtol=1e-3)

    # bf16 path: the one-hot contraction of bf16 values is an exact copy.
    xb = x.astype(jnp.bfloat16)
    yb = jax.block_until_ready(interpolate_nearest(xb, size))
    assert jnp.array_equal(yb, _reference_nearest(xb, size))

    print("KERNEL_OK")
</pallas_src>

<mosaic_0001>
module attributes {stable_mosaic.version = 11 : i64} {
  func.func @_interp_kernel(%arg0: i32, %arg1: memref<8x16x16xf32, #tpu.memory_space<vmem>>, %arg2: memref<32x16xf32, #tpu.memory_space<vmem>>, %arg3: memref<16x32xf32, #tpu.memory_space<vmem>>, %arg4: memref<8x32x32xf32, #tpu.memory_space<vmem>>) attributes {dimension_semantics = [#tpu.dimension_semantics<parallel>], iteration_bounds = array<i64: 1>, scalar_prefetch = 0 : i64, scratch_operands = 0 : i64, tpu.core_type = #tpu.core_type<tc>, window_params = [{transform_indices = @transform_0, window_bounds = array<i64: 8, 16, 16>}, {pipeline_mode = #tpu.pipeline_mode<synchronous>, transform_indices = @transform_1, window_bounds = array<i64: 32, 16>}, {pipeline_mode = #tpu.pipeline_mode<synchronous>, transform_indices = @transform_2, window_bounds = array<i64: 16, 32>}, {transform_indices = @transform_3, window_bounds = array<i64: 8, 32, 32>}]} {
    %c0 = arith.constant 0 : index
    %c0_0 = arith.constant 0 : index
    %c0_1 = arith.constant 0 : index
    %0 = vector.load %arg1[%c0, %c0_0, %c0_1] : memref<8x16x16xf32, #tpu.memory_space<vmem>>, vector<8x16x16xf32>
    %c0_2 = arith.constant 0 : index
    %c0_3 = arith.constant 0 : index
    %1 = vector.load %arg2[%c0_2, %c0_3] : memref<32x16xf32, #tpu.memory_space<vmem>>, vector<32x16xf32>
    %2 = vector.shape_cast %1 : vector<32x16xf32> to vector<1x32x16xf32>
    %3 = vector.shape_cast %2 : vector<1x32x16xf32> to vector<1x32x16xf32>
    %4 = vector.broadcast %3 : vector<1x32x16xf32> to vector<8x32x16xf32>
    %c0_4 = arith.constant 0 : index
    %c0_5 = arith.constant 0 : index
    %5 = vector.load %arg3[%c0_4, %c0_5] : memref<16x32xf32, #tpu.memory_space<vmem>>, vector<16x32xf32>
    %6 = vector.shape_cast %5 : vector<16x32xf32> to vector<1x16x32xf32>
    %7 = vector.shape_cast %6 : vector<1x16x32xf32> to vector<1x16x32xf32>
    %8 = vector.broadcast %7 : vector<1x16x32xf32> to vector<8x16x32xf32>
    %cst = arith.constant dense<0.000000e+00> : vector<8x32x16xf32>
    %9 = tpu.matmul %4, %0, %cst {dimension_numbers = #tpu.dot_dimension_numbers<[2], [1], [1], [2], [0, 0, 0, 1, 1, 2], [0], [0]>} : vector<8x32x16xf32>, vector<8x16x16xf32>, vector<8x32x16xf32> -> vector<8x32x16xf32>
    %cst_6 = arith.constant dense<0.000000e+00> : vector<8x32x32xf32>
    %10 = tpu.matmul %9, %8, %cst_6 {dimension_numbers = #tpu.dot_dimension_numbers<[2], [1], [1], [2], [0, 0, 0, 1, 1, 2], [0], [0]>} : vector<8x32x16xf32>, vector<8x16x32xf32>, vector<8x32x32xf32> -> vector<8x32x32xf32>
    %c0_7 = arith.constant 0 : index
    %c0_8 = arith.constant 0 : index
    %c0_9 = arith.constant 0 : index
    %11 = vector.load %arg4[%c0_7, %c0_8, %c0_9] : memref<8x32x32xf32, #tpu.memory_space<vmem>>, vector<8x32x32xf32>
    tpu.vector_store %arg4[%c0_7, %c0_8, %c0_9], %10 {strides = array<i32>} : memref<8x32x32xf32, #tpu.memory_space<vmem>>, vector<8x32x32xf32>,
    return
  }
  func.func @transform_0(%arg0: i32) -> (i32, i32, i32) {
    %c0_i32 = arith.constant 0 : i32
    %c0_i32_0 = arith.constant 0 : i32
    %c0_i32_1 = arith.constant 0 : i32
    return %arg0, %c0_i32, %c0_i32_0 : i32, i32, i32
  }
  func.func @transform_1(%arg0: i32) -> (i32, i32) {
    %c0_i32 = arith.constant 0 : i32
    %c0_i32_0 = arith.constant 0 : i32
    %c0_i32_1 = arith.constant 0 : i32
    return %c0_i32, %c0_i32_0 : i32, i32
  }
  func.func @transform_2(%arg0: i32) -> (i32, i32) {
    %c0_i32 = arith.constant 0 : i32
    %c0_i32_0 = arith.constant 0 : i32
    %c0_i32_1 = arith.constant 0 : i32
    return %c0_i32, %c0_i32_0 : i32, i32
  }
  func.func @transform_3(%arg0: i32) -> (i32, i32, i32) {
    %c0_i32 = arith.constant 0 : i32
    %c0_i32_0 = arith.constant 0 : i32
    %c0_i32_1 = arith.constant 0 : i32
    return %arg0, %c0_i32, %c0_i32_0 : i32, i32, i32
  }
}

</mosaic_0001>

<bundles_post_ra>
// kernel: interpolate_nearest.1
= control target key start
LH: loop header
LB: loop body
LE: loop exit
PB: predicated region body
PF: predicated region fallthrough
CT: control target
= control target key end

     0   :  { %8 = vsyncpa [#allocation3], 0  ;;  %s2309_s0 = inlined_call_operand.hbm [shape: f32[8,16,16], index: 0, kind: input, shape index: {}]   ;;  %s2310_s1 = inlined_call_operand.hbm [shape: f32[32,16], index: 1, kind: input, shape index: {}]   ;;  %s2311_s2 = inlined_call_operand.hbm [shape: f32[16,32], index: 2, kind: input, shape index: {}]   ;;  %s2312_s3 = inlined_call_operand.hbm [shape: f32[8,32,32], index: 3, kind: output, shape index: {}]  }
   0x1   :  { %9 = vsyncpa [#allocation6], 0 }
   0x2   :  { %10 = vsyncpa [#allocation4], 0  ;;  %s2082_s12 = smov [#allocation5]   ;;  %s2083_s14 = smov [#allocation2]  }
   0x3   :  { %s28_s13 = sshll.u32 %s2082_s12, 4  ;;  %s16_s15 = sshll.u32 %s2083_s14, 4  ;;  %s29_s13 = int_to_ptr.vmem [resolvable:$true] %s28_s13  ;;  %s2108_s15 = int_to_ptr.vmem [resolvable:$true] %s16_s15 }
   0x4   :  { %s1988_s18 = scalar_lea.hbm %s2310_s1, 512 }
   0x5   :  { %p1989_p0 = scmp.ne.s32.totalorder %s2310_s1, %s1988_s18  ;;  %p1992_p1 = scmp.lt.u32.totalorder %s1988_s18, %s2310_s1 }
   0x7   :  { %p1994_p2 = pnand %p1992_p1, %p1989_p0 }
   0x9   :  { %1997 = shalt.err (!%p1994_p2)
}
   0xa   :  { %s1998_s23 = scalar_lea.vmem %s29_s13, 512  ;;  %p2003_p4 = scmp.lt.s32.totalorder %s29_s13, %s29_s13 }
   0xb   :  { %p1999_p3 = scmp.ne.s32.totalorder %s29_s13, %s1998_s23  ;;  %p2004_p5 = scmp.lt.s32.totalorder %s1998_s23, %s1998_s23 }
   0xd   :  { %p2005_p6 = por %p2004_p5, %p2003_p4 }
   0xf   :  { %p2006_p7 = pnand %p2005_p6, %p1999_p3 }
  0x11   :  { %2009 = shalt.err (!%p2006_p7)
}
  0x12   :  { %s2084_s24 = smov 128   ;;  %s2085_s25 = smov 8  }
  0x13   :  { %34 = dma.hbm_to_vmem [thread:$0]  %s2310_s1, 512, %s29_s13, [#allocation6], %s2084_s24, %s2084_s24, %s2085_s25  }
  0x14   :  { %s2010_s30 = scalar_lea.hbm %s2309_s0, 2048 }
  0x15   :  { %p2011_p8 = scmp.ne.s32.totalorder %s2309_s0, %s2010_s30  ;;  %p2014_p9 = scmp.lt.u32.totalorder %s2010_s30, %s2309_s0 }
  0x17   :  { %p2016_p10 = pnand %p2014_p9, %p2011_p8 }
  0x19   :  { %2019 = shalt.err (!%p2016_p10)
}
  0x1a   :  { %s2020_s8 = scalar_lea.vmem %s2108_s15, 2048  ;;  %p2025_p12 = scmp.lt.s32.totalorder %s2108_s15, %s2108_s15 }
  0x1b   :  { %p2021_p11 = scmp.ne.s32.totalorder %s2108_s15, %s2020_s8  ;;  %p2026_p13 = scmp.lt.s32.totalorder %s2020_s8, %s2020_s8 }
  0x1d   :  { %p2027_p0 = por %p2026_p13, %p2025_p12 }
  0x1f   :  { %p2028_p1 = pnand %p2027_p0, %p2021_p11 }
  0x21   :  { %2031 = shalt.err (!%p2028_p1)
}
  0x22   :  { %22 = dma.hbm_to_vmem [thread:$0]  %s2309_s0, 2048, %s2108_s15, [#allocation3], %s2084_s24, %s2084_s24, %s2085_s25  }
  0x23   :  { %s2086_s10 = smov [#allocation7]   ;;  %s2032_s14 = scalar_lea.hbm %s2311_s2, 256 }
  0x24   :  { %s40_s11 = sshll.u32 %s2086_s10, 4  ;;  %p2033_p2 = scmp.ne.s32.totalorder %s2311_s2, %s2032_s14  ;;  %s41_s11 = int_to_ptr.vmem [resolvable:$true] %s40_s11 }
  0x25   :  { %p2036_p3 = scmp.lt.u32.totalorder %s2032_s14, %s2311_s2 }
  0x27   :  { %p2038_p4 = pnand %p2036_p3, %p2033_p2 }
  0x29   :  { %2041 = shalt.err (!%p2038_p4)
}
  0x2a   :  { %s2042_s20 = scalar_lea.vmem %s41_s11, 256  ;;  %p2047_p6 = scmp.lt.s32.totalorder %s41_s11, %s41_s11 }
  0x2b   :  { %p2043_p5 = scmp.ne.s32.totalorder %s41_s11, %s2042_s20  ;;  %p2048_p7 = scmp.lt.s32.totalorder %s2042_s20, %s2042_s20 }
  0x2d   :  { %p2049_p8 = por %p2048_p7, %p2047_p6 }
  0x2f   :  { %p2050_p9 = pnand %p2049_p8, %p2043_p5 }
  0x31   :  { %2053 = shalt.err (!%p2050_p9)
}
  0x32   :  { %46 = dma.hbm_to_vmem [thread:$0]  %s2311_s2, 256, %s41_s11, [#allocation6], %s2084_s24, %s2084_s24, %s2085_s25  }
  0x33   :  { %2076 = dma.done.wait [#allocation3], 2048  }
  0x34   :  { %2077 = vsyncadd [#allocation3], 4294965248 }
  0x35   :  { %2078 = dma.done.wait [#allocation6], 768  }
  0x36   :  { %2079 = vsyncadd [#allocation6], 4294966528  ;;  %vm78_vm0 = vcmask 130048   ;;  %v56_v0 = vld [vmem:[#allocation2] sm:$0xff]  ;;  %v57_v1 = vld [vmem:[#allocation2 + $0x8] sm:$0xff]  ;;  %vm1547_vm1 = vcmask 261120  }
  0x37   :  { %v58_v2 = vld [vmem:[#allocation2 + $0x10] sm:$0xff]  ;;  %v1918_v3 = vpack.c.bf16 %v57_v1, %v56_v0  ;;  %v59_v4 = vld [vmem:[#allocation2 + $0x18] sm:$0xff]  ;;  %v2160_v5 = vld [vmem:[#allocation5] sm:$0xff]  ;;  %s2087_s2 = smov [#allocation8]  }
  0x38   :  { %v1922_v6 = vpack.c.bf16 %v59_v4, %v58_v2  ;;  %1762 = vmatprep.mubr.msk.f32.mxu0 %vm78_vm0, %v2160_v5  ;;  %1772 = vmatprep.mubr.msk.f32.mxu1 %vm78_vm0, %v2160_v5  ;;  %v60_v7 = vld [vmem:[#allocation2 + $0x20] sm:$0xff]  ;;  %v61_v8 = vld [vmem:[#allocation2 + $0x28] sm:$0xff]  ;;  %v62_v9 = vld [vmem:[#allocation2 + $0x30] sm:$0xff]  ;;  %s1585_s21 = sshll.u32 %s2087_s2, 4  ;;  %s1586_s21 = int_to_ptr.vmem [resolvable:$true] %s1585_s21 }
  0x39   :  { %1919 = vmatprep.subr.bf16.mxu0 %v1918_v3  ;;  %v2166_v10 = vld [vmem:[#allocation5 + $0x8] sm:$0xff]  ;;  %v1926_v11 = vpack.c.bf16 %v61_v8, %v60_v7  ;;  %v63_v12 = vld [vmem:[#allocation2 + $0x38] sm:$0xff]  ;;  %v64_v14 = vld [vmem:[#allocation2 + $0x40] sm:$0xff]  ;;  %s2054_s22 = scalar_lea.vmem %s1586_s21, 4096  ;;  %p2059_p11 = scmp.lt.s32.totalorder %s1586_s21, %s1586_s21 }
  0x3a   :  { %1923 = vmatprep.subr.bf16.mxu1 %v1922_v6  ;;  %1921 = vmatpush3.bf16.msra.mxu0 %v1918_v3  ;;  %v1930_v13 = vpack.c.bf16 %v63_v12, %v62_v9  ;;  %v65_v15 = vld [vmem:[#allocation2 + $0x48] sm:$0xff]  ;;  %v66_v16 = vld [vmem:[#allocation2 + $0x50] sm:$0xff]  ;;  %v67_v17 = vld [vmem:[#allocation2 + $0x58] sm:$0xff]  ;;  %p2055_p10 = scmp.ne.s32.totalorder %s1586_s21, %s2054_s22  ;;  %p2060_p12 = scmp.lt.s32.totalorder %s2054_s22, %s2054_s22 }
  0x3b   :  { %1925 = vmatpush3.bf16.msra.mxu1 %v1922_v6  ;;  %1927 = vmatprep.subr.bf16.mxu0 %v1926_v11  ;;  %v74_v18 = vld [vmem:[#allocation5 + $0x10] sm:$0xff]  ;;  %v1934_v19 = vpack.c.bf16 %v65_v15, %v64_v14  ;;  %v1938_v20 = vpack.c.bf16 %v67_v17, %v66_v16  ;;  %v75_v21 = vld [vmem:[#allocation5 + $0x18] sm:$0xff]  ;;  %v68_v22 = vld [vmem:[#allocation2 + $0x60] sm:$0xff] }
  0x3c   :  { %1931 = vmatprep.subr.bf16.mxu1 %v1930_v13  ;;  %v69_v23 = vld [vmem:[#allocation2 + $0x68] sm:$0xff]  ;;  %v70_v24 = vld [vmem:[#allocation2 + $0x70] sm:$0xff]  ;;  %v71_v25 = vld [vmem:[#allocation2 + $0x78] sm:$0xff]  ;;  %p2061_p13 = por %p2060_p12, %p2059_p11 }
  0x3d   :  { %1763 = vmatmul.mubr.msk.f32.vlgmr.msra.gmra.mrb[0].mxu0 %vm78_vm0, %v2166_v10  ;;  %v1942_v26 = vpack.c.bf16 %v69_v23, %v68_v22  ;;  %v1946_v27 = vpack.c.bf16 %v71_v25, %v70_v24  ;;  %v76_v28 = vld [vmem:[#allocation7] sm:$0xff]  ;;  %v77_v29 = vld [vmem:[#allocation7 + $0x8] sm:$0xff] }
  0x3e   :  { %1773 = vmatmul.mubr.msk.f32.vlgmr.msra.gmra.mrb[0].mxu1 %vm78_vm0, %v2166_v10  ;;  %1929 = vmatpush3.bf16.msra.mxu0 %v1926_v11  ;;  %v2192_v30 = vpack.c.bf16 %v77_v29, %v76_v28  ;;  %p2062_p0 = pnand %p2061_p13, %p2055_p10 }
  0x3f   :  { %1933 = vmatpush3.bf16.msra.mxu1 %v1930_v13  ;;  %1765 = vmatprep.mubr.msk.f32.mxu0 %vm78_vm0, %v74_v18 }
  0x40   :  { %1775 = vmatprep.mubr.msk.f32.mxu1 %vm78_vm0, %v74_v18  ;;  %1935 = vmatprep.subr.bf16.mxu0 %v1934_v19 }
  0x41   :  { %1766 = vmatmul.mubr.msk.f32.gmra.mrb[2].mxu0 %vm78_vm0, %v75_v21  ;;  %1939 = vmatprep.subr.bf16.mxu1 %v1938_v20 }
  0x42   :  { %1776 = vmatmul.mubr.msk.f32.gmra.mrb[2].mxu1 %vm78_vm0, %v75_v21  ;;  %1782 = vmatprep.mubr.msk.f32.mxu0 %vm78_vm0, %v2160_v5 }
  0x43   :  { %1792 = vmatprep.mubr.msk.f32.mxu1 %vm78_vm0, %v2160_v5 }
  0x45   :  { %1783 = vmatmul.mubr.msk.f32.vlgmr.msra.gmra.mrb[4].mxu0 %vm78_vm0, %v2166_v10 }
  0x46   :  { %1793 = vmatmul.mubr.msk.f32.vlgmr.msra.gmra.mrb[4].mxu1 %vm78_vm0, %v2166_v10  ;;  %1937 = vmatpush3.bf16.msra.mxu0 %v1934_v19 }
  0x47   :  { %1941 = vmatpush3.bf16.msra.mxu1 %v1938_v20  ;;  %1785 = vmatprep.mubr.msk.f32.mxu0 %vm78_vm0, %v74_v18 }
  0x48   :  { %1795 = vmatprep.mubr.msk.f32.mxu1 %vm78_vm0, %v74_v18  ;;  %1943 = vmatprep.subr.bf16.mxu0 %v1942_v26 }
  0x49   :  { %1786 = vmatmul.mubr.msk.f32.gmra.mrb[6].mxu0 %vm78_vm0, %v75_v21  ;;  %1947 = vmatprep.subr.bf16.mxu1 %v1946_v27 }
  0x4a   :  { %1796 = vmatmul.mubr.msk.f32.gmra.mrb[6].mxu1 %vm78_vm0, %v75_v21  ;;  %1802 = vmatprep.mubr.msk.f32.mxu0 %vm78_vm0, %v2160_v5 }
  0x4b   :  { %1812 = vmatprep.mubr.msk.f32.mxu1 %vm78_vm0, %v2160_v5 }
  0x4d   :  { %1803 = vmatmul.mubr.msk.f32.vlgmr.msra.gmra.mrb[8].mxu0 %vm78_vm0, %v2166_v10 }
  0x4e   :  { %1813 = vmatmul.mubr.msk.f32.vlgmr.msra.gmra.mrb[8].mxu1 %vm78_vm0, %v2166_v10  ;;  %1945 = vmatpush3.bf16.msra.mxu0 %v1942_v26 }
  0x4f   :  { %1949 = vmatpush3.bf16.msra.mxu1 %v1946_v27  ;;  %1805 = vmatprep.mubr.msk.f32.mxu0 %vm78_vm0, %v74_v18 }
  0x50   :  { %1815 = vmatprep.mubr.msk.f32.mxu1 %vm78_vm0, %v74_v18  ;;  %1951 = vmatprep.subr.bf16.mxu0 %v2192_v30 }
  0x51   :  { %1806 = vmatmul.mubr.msk.f32.gmra.mrb[10].mxu0 %vm78_vm0, %v75_v21  ;;  %1955 = vmatprep.subr.bf16.mxu1 %v2192_v30 }
  0x52   :  { %1816 = vmatmul.mubr.msk.f32.gmra.mrb[10].mxu1 %vm78_vm0, %v75_v21  ;;  %1822 = vmatprep.mubr.msk.f32.mxu0 %vm78_vm0, %v2160_v5 }
  0x53   :  { %1832 = vmatprep.mubr.msk.f32.mxu1 %vm78_vm0, %v2160_v5 }
  0x55   :  { %1823 = vmatmul.mubr.msk.f32.vlgmr.msra.gmra.mrb[12].mxu0 %vm78_vm0, %v2166_v10 }
  0x56   :  { %1833 = vmatmul.mubr.msk.f32.vlgmr.msra.gmra.mrb[12].mxu1 %vm78_vm0, %v2166_v10  ;;  %1825 = vmatprep.mubr.msk.f32.mxu0 %vm78_vm0, %v74_v18 }
  0x57   :  { %1835 = vmatprep.mubr.msk.f32.mxu1 %vm78_vm0, %v74_v18  ;;  %1953 = vmatpush3.bf16.msra.mxu0 %v2192_v30 }
  0x58   :  { %1957 = vmatpush3.bf16.msra.mxu1 %v2192_v30  ;;  %1959 = vmatprep.subr.bf16.mxu0 %v2192_v30 }
  0x59   :  { %1826 = vmatmul.mubr.msk.f32.gmra.mrb[14].mxu0 %vm78_vm0, %v75_v21  ;;  %1963 = vmatprep.subr.bf16.mxu1 %v2192_v30 }
  0x5a   :  { %1836 = vmatmul.mubr.msk.f32.gmra.mrb[14].mxu1 %vm78_vm0, %v75_v21 }
 0x110   :  { %v1764_v31 = vpop.f32.mrb[0].mxu0 }
 0x111   :  { %v1774_v32 = vpop.f32.mrb[0].mxu1  ;;  %v157_v33 = vpop.f32.mrb[1].mxu0 }
 0x112   :  { %v242_v34 = vpop.f32.mrb[1].mxu1  ;;  %1842 = vmatprep.mubr.msk.f32.mxu0 %vm78_vm0, %v157_v33 }
 0x113   :  { %1852 = vmatprep.mubr.msk.f32.mxu1 %vm78_vm0, %v242_v34  ;;  %1843 = vmatmul.mubr.msk.f32.vlgmr.msra.gmra.mrb[16].mxu0 %vm78_vm0, %v1764_v31 }
 0x114   :  { %1853 = vmatmul.mubr.msk.f32.vlgmr.msra.gmra.mrb[16].mxu1 %vm78_vm0, %v1774_v32  ;;  %v1767_v35 = vpop.f32.mrb[2].mxu0  ;;  %1961 = vmatpush3.bf16.msra.mxu0 %v2192_v30 }
 0x115   :  { %v1777_v36 = vpop.f32.mrb[2].mxu1  ;;  %1965 = vmatpush3.bf16.msra.mxu1 %v2192_v30  ;;  %v167_v37 = vpop.f32.mrb[3].mxu0  ;;  %1967 = vmatprep.subr.bf16.mxu0 %v2192_v30 }
 0x116   :  { %v252_v38 = vpop.f32.mrb[3].mxu1  ;;  %1845 = vmatprep.mubr.msk.f32.mxu0 %vm78_vm0, %v167_v37  ;;  %1971 = vmatprep.subr.bf16.mxu1 %v2192_v30 }
 0x117   :  { %1855 = vmatprep.mubr.msk.f32.mxu1 %vm78_vm0, %v252_v38  ;;  %1846 = vmatmul.mubr.msk.f32.gmra.mrb[18].mxu0 %vm78_vm0, %v1767_v35 }
 0x118   :  { %1856 = vmatmul.mubr.msk.f32.gmra.mrb[18].mxu1 %vm78_vm0, %v1777_v36  ;;  %v1784_v39 = vpop.f32.mrb[4].mxu0 }
 0x119   :  { %v1794_v40 = vpop.f32.mrb[4].mxu1  ;;  %v327_v41 = vpop.f32.mrb[5].mxu0 }
 0x11a   :  { %v412_v42 = vpop.f32.mrb[5].mxu1  ;;  %1862 = vmatprep.mubr.msk.f32.mxu0 %vm78_vm0, %v327_v41 }
 0x11b   :  { %1872 = vmatprep.mubr.msk.f32.mxu1 %vm78_vm0, %v412_v42  ;;  %1863 = vmatmul.mubr.msk.f32.vlgmr.msra.gmra.mrb[20].mxu0 %vm78_vm0, %v1784_v39 }
 0x11c   :  { %1873 = vmatmul.mubr.msk.f32.vlgmr.msra.gmra.mrb[20].mxu1 %vm78_vm0, %v1794_v40  ;;  %v1787_v43 = vpop.f32.mrb[6].mxu0  ;;  %1969 = vmatpush3.bf16.msra.mxu0 %v2192_v30 }
 0x11d   :  { %v1797_v44 = vpop.f32.mrb[6].mxu1  ;;  %1973 = vmatpush3.bf16.msra.mxu1 %v2192_v30  ;;  %v337_v45 = vpop.f32.mrb[7].mxu0  ;;  %1975 = vmatprep.subr.bf16.mxu0 %v2192_v30 }
 0x11e   :  { %v422_v46 = vpop.f32.mrb[7].mxu1  ;;  %1865 = vmatprep.mubr.msk.f32.mxu0 %vm78_vm0, %v337_v45  ;;  %1979 = vmatprep.subr.bf16.mxu1 %v2192_v30 }
 0x11f   :  { %1875 = vmatprep.mubr.msk.f32.mxu1 %vm78_vm0, %v422_v46  ;;  %1866 = vmatmul.mubr.msk.f32.gmra.mrb[22].mxu0 %vm78_vm0, %v1787_v43 }
 0x120   :  { %1876 = vmatmul.mubr.msk.f32.gmra.mrb[22].mxu1 %vm78_vm0, %v1797_v44  ;;  %v1804_v47 = vpop.f32.mrb[8].mxu0 }
 0x121   :  { %v1814_v48 = vpop.f32.mrb[8].mxu1  ;;  %v497_v49 = vpop.f32.mrb[9].mxu0 }
 0x122   :  { %v582_v50 = vpop.f32.mrb[9].mxu1  ;;  %1882 = vmatprep.mubr.msk.f32.mxu0 %vm78_vm0, %v497_v49 }
 0x123   :  { %1892 = vmatprep.mubr.msk.f32.mxu1 %vm78_vm0, %v582_v50  ;;  %1883 = vmatmul.mubr.msk.f32.vlgmr.msra.gmra.mrb[24].mxu0 %vm78_vm0, %v1804_v47 }
 0x124   :  { %1893 = vmatmul.mubr.msk.f32.vlgmr.msra.gmra.mrb[24].mxu1 %vm78_vm0, %v1814_v48  ;;  %v1807_v51 = vpop.f32.mrb[10].mxu0  ;;  %1977 = vmatpush3.bf16.msra.mxu0 %v2192_v30 }
 0x125   :  { %v1817_v52 = vpop.f32.mrb[10].mxu1  ;;  %1981 = vmatpush3.bf16.msra.mxu1 %v2192_v30  ;;  %v507_v53 = vpop.f32.mrb[11].mxu0 }
 0x126   :  { %v592_v54 = vpop.f32.mrb[11].mxu1  ;;  %1885 = vmatprep.mubr.msk.f32.mxu0 %vm78_vm0, %v507_v53 }
 0x127   :  { %1895 = vmatprep.mubr.msk.f32.mxu1 %vm78_vm0, %v592_v54  ;;  %1886 = vmatmul.mubr.msk.f32.gmra.mrb[26].mxu0 %vm78_vm0, %v1807_v51 }
 0x128   :  { %1896 = vmatmul.mubr.msk.f32.gmra.mrb[26].mxu1 %vm78_vm0, %v1817_v52  ;;  %v1824_v55 = vpop.f32.mrb[12].mxu0 }
 0x129   :  { %v1834_v56 = vpop.f32.mrb[12].mxu1  ;;  %v667_v57 = vpop.f32.mrb[13].mxu0 }
 0x12a   :  { %v752_v58 = vpop.f32.mrb[13].mxu1  ;;  %1902 = vmatprep.mubr.msk.f32.mxu0 %vm78_vm0, %v667_v57 }
 0x12b   :  { %1912 = vmatprep.mubr.msk.f32.mxu1 %vm78_vm0, %v752_v58  ;;  %1903 = vmatmul.mubr.msk.f32.vlgmr.msra.gmra.mrb[28].mxu0 %vm78_vm0, %v1824_v55 }
 0x12c   :  { %1913 = vmatmul.mubr.msk.f32.vlgmr.msra.gmra.mrb[28].mxu1 %vm78_vm0, %v1834_v56  ;;  %v1827_v59 = vpop.f32.mrb[14].mxu0 }
 0x12d   :  { %v1837_v60 = vpop.f32.mrb[14].mxu1  ;;  %v677_v61 = vpop.f32.mrb[15].mxu0 }
 0x12e   :  { %v762_v62 = vpop.f32.mrb[15].mxu1  ;;  %1905 = vmatprep.mubr.msk.f32.mxu0 %vm78_vm0, %v677_v61 }
 0x12f   :  { %1915 = vmatprep.mubr.msk.f32.mxu1 %vm78_vm0, %v762_v62  ;;  %1906 = vmatmul.mubr.msk.f32.gmra.mrb[30].mxu0 %vm78_vm0, %v1827_v59 }
 0x130   :  { %1916 = vmatmul.mubr.msk.f32.gmra.mrb[30].mxu1 %vm78_vm0, %v1837_v60 }
 0x1e6   :  { %v1844_v63 = vpop.f32.mrb[16].mxu0 }
 0x1e7   :  { %1549 = vst.msk [vmem:[#allocation8 + $0x8] sm:$0xff] %vm1547_vm1, %v1844_v63  ;;  %v1854_v0 = vpop.f32.mrb[16].mxu1  ;;  %v849_v1 = vpop.f32.mrb[17].mxu0 }
 0x1e8   :  { %1553 = vst.msk [vmem:[#allocation8 + $0x28] sm:$0xff] %vm1547_vm1, %v1854_v0  ;;  %1548 = vst.msk [vmem:[#allocation8] sm:$0xff] %vm1547_vm1, %v849_v1  ;;  %v946_v2 = vpop.f32.mrb[17].mxu1 }
 0x1e9   :  { %1552 = vst.msk [vmem:[#allocation8 + $0x20] sm:$0xff] %vm1547_vm1, %v946_v2 }
 0x1ea   :  { %v1847_v3 = vpop.f32.mrb[18].mxu0 }
 0x1eb   :  { %1551 = vst.msk [vmem:[#allocation8 + $0x18] sm:$0xff] %vm1547_vm1, %v1847_v3  ;;  %v1857_v4 = vpop.f32.mrb[18].mxu1  ;;  %v859_v5 = vpop.f32.mrb[19].mxu0 }
 0x1ec   :  { %1555 = vst.msk [vmem:[#allocation8 + $0x38] sm:$0xff] %vm1547_vm1, %v1857_v4  ;;  %1550 = vst.msk [vmem:[#allocation8 + $0x10] sm:$0xff] %vm1547_vm1, %v859_v5  ;;  %v956_v6 = vpop.f32.mrb[19].mxu1 }
 0x1ed   :  { %1554 = vst.msk [vmem:[#allocation8 + $0x30] sm:$0xff] %vm1547_vm1, %v956_v6 }
 0x1ee   :  { %v1864_v7 = vpop.f32.mrb[20].mxu0 }
 0x1ef   :  { %1557 = vst.msk [vmem:[#allocation8 + $0x48] sm:$0xff] %vm1547_vm1, %v1864_v7  ;;  %v1874_v8 = vpop.f32.mrb[20].mxu1  ;;  %v1043_v9 = vpop.f32.mrb[21].mxu0 }
 0x1f0   :  { %1561 = vst.msk [vmem:[#allocation8 + $0x68] sm:$0xff] %vm1547_vm1, %v1874_v8  ;;  %1556 = vst.msk [vmem:[#allocation8 + $0x40] sm:$0xff] %vm1547_vm1, %v1043_v9  ;;  %v1140_v10 = vpop.f32.mrb[21].mxu1 }
 0x1f1   :  { %1560 = vst.msk [vmem:[#allocation8 + $0x60] sm:$0xff] %vm1547_vm1, %v1140_v10 }
 0x1f2   :  { %v1867_v11 = vpop.f32.mrb[22].mxu0 }
 0x1f3   :  { %1559 = vst.msk [vmem:[#allocation8 + $0x58] sm:$0xff] %vm1547_vm1, %v1867_v11  ;;  %v1877_v12 = vpop.f32.mrb[22].mxu1  ;;  %v1053_v13 = vpop.f32.mrb[23].mxu0 }
 0x1f4   :  { %1563 = vst.msk [vmem:[#allocation8 + $0x78] sm:$0xff] %vm1547_vm1, %v1877_v12  ;;  %1558 = vst.msk [vmem:[#allocation8 + $0x50] sm:$0xff] %vm1547_vm1, %v1053_v13  ;;  %v1150_v14 = vpop.f32.mrb[23].mxu1 }
 0x1f5   :  { %1562 = vst.msk [vmem:[#allocation8 + $0x70] sm:$0xff] %vm1547_vm1, %v1150_v14 }
 0x1f6   :  { %v1884_v15 = vpop.f32.mrb[24].mxu0 }
 0x1f7   :  { %1565 = vst.msk [vmem:[#allocation8 + $0x88] sm:$0xff] %vm1547_vm1, %v1884_v15  ;;  %v1894_v16 = vpop.f32.mrb[24].mxu1  ;;  %v1237_v17 = vpop.f32.mrb[25].mxu0 }
 0x1f8   :  { %1569 = vst.msk [vmem:[#allocation8 + $0xa8] sm:$0xff] %vm1547_vm1, %v1894_v16  ;;  %1564 = vst.msk [vmem:[#allocation8 + $0x80] sm:$0xff] %vm1547_vm1, %v1237_v17  ;;  %v1334_v18 = vpop.f32.mrb[25].mxu1 }
 0x1f9   :  { %1568 = vst.msk [vmem:[#allocation8 + $0xa0] sm:$0xff] %vm1547_vm1, %v1334_v18 }
 0x1fa   :  { %v1887_v19 = vpop.f32.mrb[26].mxu0 }
 0x1fb   :  { %1567 = vst.msk [vmem:[#allocation8 + $0x98] sm:$0xff] %vm1547_vm1, %v1887_v19  ;;  %v1897_v20 = vpop.f32.mrb[26].mxu1  ;;  %v1247_v21 = vpop.f32.mrb[27].mxu0 }
 0x1fc   :  { %1571 = vst.msk [vmem:[#allocation8 + $0xb8] sm:$0xff] %vm1547_vm1, %v1897_v20  ;;  %1566 = vst.msk [vmem:[#allocation8 + $0x90] sm:$0xff] %vm1547_vm1, %v1247_v21  ;;  %v1344_v22 = vpop.f32.mrb[27].mxu1 }
 0x1fd   :  { %1570 = vst.msk [vmem:[#allocation8 + $0xb0] sm:$0xff] %vm1547_vm1, %v1344_v22 }
 0x1fe   :  { %v1904_v23 = vpop.f32.mrb[28].mxu0 }
 0x1ff   :  { %1573 = vst.msk [vmem:[#allocation8 + $0xc8] sm:$0xff] %vm1547_vm1, %v1904_v23  ;;  %v1914_v24 = vpop.f32.mrb[28].mxu1  ;;  %v1431_v25 = vpop.f32.mrb[29].mxu0 }
 0x200   :  { %1577 = vst.msk [vmem:[#allocation8 + $0xe8] sm:$0xff] %vm1547_vm1, %v1914_v24  ;;  %1572 = vst.msk [vmem:[#allocation8 + $0xc0] sm:$0xff] %vm1547_vm1, %v1431_v25  ;;  %v1528_v26 = vpop.f32.mrb[29].mxu1 }
 0x201   :  { %1576 = vst.msk [vmem:[#allocation8 + $0xe0] sm:$0xff] %vm1547_vm1, %v1528_v26 }
 0x202   :  { %v1907_v27 = vpop.f32.mrb[30].mxu0 }
 0x203   :  { %1575 = vst.msk [vmem:[#allocation8 + $0xd8] sm:$0xff] %vm1547_vm1, %v1907_v27  ;;  %v1917_v28 = vpop.f32.mrb[30].mxu1  ;;  %v1441_v29 = vpop.f32.mrb[31].mxu0 }
 0x204   :  { %1579 = vst.msk [vmem:[#allocation8 + $0xf8] sm:$0xff] %vm1547_vm1, %v1917_v28  ;;  %1574 = vst.msk [vmem:[#allocation8 + $0xd0] sm:$0xff] %vm1547_vm1, %v1441_v29  ;;  %v1538_v30 = vpop.f32.mrb[31].mxu1 }
 0x205   :  { %1578 = vst.msk [vmem:[#allocation8 + $0xf0] sm:$0xff] %vm1547_vm1, %v1538_v30 }
 0x206   :  { %2065 = shalt.err (!%p2062_p0)
}
 0x207   :  { %s2066_s27 = scalar_lea.hbm %s2312_s3, 4096 }
 0x208   :  { %p2067_p1 = scmp.ne.s32.totalorder %s2312_s3, %s2066_s27  ;;  %p2070_p2 = scmp.lt.u32.totalorder %s2066_s27, %s2312_s3 }
 0x20a   :  { %p2072_p3 = pnand %p2070_p2, %p2067_p1 }
 0x20c   :  { %2075 = shalt.err (!%p2072_p3)
}
 0x20d   :  { %1591 = dma.vmem_to_hbm [thread:$0]  %s1586_s21, 4096, %s2312_s3, [#allocation4], %s2084_s24, %s2084_s24, %s2085_s25  }
 0x20e   :  { %2080 = dma.done.wait [#allocation4], 4096  }
 0x20f   :  { %2081 = vsyncadd [#allocation4], 4294963200 }
 0x210   :  { %1595 = vsyncpa [#allocation3], 1 }
 0x211   :  { %1596 = vsyncpa [#allocation6], 1 }
 0x212   :  { %1597 = vsyncpa [#allocation4], 1 }

</bundles_post_ra>
